<compile_context>
chip_gen: v6e
topology: v6e:2x2x1
jax: 0.10.0
libtpu: 0.0.40
codegen_flags: <defaults>
</compile_context>

<pallas_src>
import math

import jax
import jax.numpy as jnp
from jax.experimental import pallas as pl
from jax.experimental.pallas import tpu as pltpu


# ---------------------------------------------------------------------------
# Kernels
# ---------------------------------------------------------------------------
def _noop_kernel(x_hbm_ref, o_hbm_ref):
    # Output aliases the input buffer and both refs stay in HBM (pl.ANY):
    # nothing to move, nothing to compute.
    del x_hbm_ref, o_hbm_ref


def _copy_kernel(x_ref, o_ref):
    # Stream the current VMEM tile through unchanged.
    o_ref[...] = x_ref[...]


# ---------------------------------------------------------------------------
# Wrappers
# ---------------------------------------------------------------------------
def _identity_aliased(x):
    """Zero-copy identity: the output buffer aliases the input buffer."""
    return pl.pallas_call(
        _noop_kernel,
        out_shape=jax.ShapeDtypeStruct(x.shape, x.dtype),
        in_specs=[pl.BlockSpec(memory_space=pl.ANY)],
        out_specs=pl.BlockSpec(memory_space=pl.ANY),
        input_output_aliases={0: 0},
    )(x)


def identity_copy(x, *, max_block_bytes=2 * 1024 * 1024):
    """Identity as an explicit HBM->VMEM->HBM streaming copy.

    Keeps the original N-D shape (no host-side pad/reshape/slice). Small
    tensors use a single whole-array block; larger ones tile only the leading
    dimension with a cdiv grid, leaving trailing dims full-extent so stores
    stay lane-dense and the (8,128) block constraint is satisfied.
    """
    if x.ndim == 0 or x.size == 0:
        # Degenerate shapes: nothing to move.
        return x

    itemsize = jnp.dtype(x.dtype).itemsize
    total_bytes = x.size * itemsize

    if total_bytes <= max_block_bytes or x.ndim == 1:
        # Whole array as one block: no grid, no (8,128) divisibility rule.
        # TODO(synk): very large 1-D inputs would need lane-dense 1-D tiling;
        # not needed for the NCHW/NLC activations this module sees.
        return pl.pallas_call(
            _copy_kernel,
            out_shape=jax.ShapeDtypeStruct(x.shape, x.dtype),
        )(x)

    lead = x.shape[0]
    rest = tuple(x.shape[1:])
    rest_bytes = itemsize * math.prod(rest)
    # TODO(synk): if a single leading-dim slice exceeds the VMEM budget
    # (rest_bytes > max_block_bytes), raise vmem_limit_bytes or tile a second
    # axis; not needed for the shapes this module is used with.
    bt = max(1, max_block_bytes // rest_bytes)
    if x.ndim == 2:
        # The tiled axis is the sublane axis: keep it a multiple of the
        # dtype-aware packed tile (8 rows f32, 16 bf16, 32 int8/fp8).
        sub = {4: 8, 2: 16, 1: 32}.get(itemsize, 8)
        bt = max(sub, (bt // sub) * sub)
    bt = min(bt, lead)

    block = (bt,) + rest
    trailing_zeros = (0,) * (x.ndim - 1)
    spec = pl.BlockSpec(block, lambda i: (i,) + trailing_zeros)

    return pl.pallas_call(
        _copy_kernel,
        out_shape=jax.ShapeDtypeStruct(x.shape, x.dtype),
        grid=(pl.cdiv(lead, bt),),
        in_specs=[spec],
        out_specs=spec,
        compiler_params=pltpu.CompilerParams(
            # Single grid axis: "parallel" lets v7x shard it across its two
            # TensorCores; harmless no-op on v5e/v6e (single TC).
            dimension_semantics=("parallel",),
        ),
    )(x)


def identity(x):
    """Pallas Identity forward pass.

    Prefers the aliased, zero-HBM-traffic kernel; conservatively falls back
    to the tiled streaming copy if aliasing cannot be lowered in this context.
    """
    if x.ndim == 0 or x.size == 0:
        return x
    try:
        return _identity_aliased(x)
    except Exception:  # pragma: no cover - conservative lowering fallback
        return identity_copy(x)


if __name__ == "__main__":
    key = jax.random.PRNGKey(0)
    k1, k2, k3 = jax.random.split(key, 3)

    # Spec shape: NCHW activation, batch=2, channels=4, spatial=16.
    x = jax.random.normal(k1, (2, 4, 16, 16), dtype=jnp.float32)
    y = identity(x)
    jax.block_until_ready(y)
    assert y.shape == x.shape, (y.shape, x.shape)
    assert y.dtype == x.dtype, (y.dtype, x.dtype)
    assert bool(jnp.all(y == x)), "Identity (aliased) output mismatch (f32)"

    # Narrow-dtype input through the primary path.
    xb = jax.random.normal(k2, (2, 8, 32), dtype=jnp.float32).astype(jnp.bfloat16)
    yb = identity(xb)
    jax.block_until_ready(yb)
    assert yb.shape == xb.shape and yb.dtype == xb.dtype
    assert bool(jnp.all(yb == xb)), "Identity (aliased) output mismatch (bf16)"

    # Explicit streaming-copy variant: whole-array-block path.
    yc = identity_copy(x)
    jax.block_until_ready(yc)
    assert yc.shape == x.shape and yc.dtype == x.dtype
    assert bool(jnp.all(yc == x)), "Identity (copy, whole block) mismatch"

    # Explicit streaming-copy variant: cdiv-grid, leading-dim-tiled path
    # (small block budget forces the grid path while keeping shapes small).
    xl = jax.random.normal(k3, (64, 32, 128), dtype=jnp.float32)
    yl = identity_copy(xl, max_block_bytes=64 * 1024)
    jax.block_until_ready(yl)
    assert yl.shape == xl.shape and yl.dtype == xl.dtype
    assert bool(jnp.all(yl == xl)), "Identity (copy, tiled) mismatch"

    print("KERNEL_OK")
</pallas_src>

<mosaic_0001>
module attributes {stable_mosaic.version = 11 : i64} {
  func.func @_noop_kernel(%arg0: memref<2x4x16x16xf32, #tpu.memory_space<any>>, %arg1: memref<2x4x16x16xf32, #tpu.memory_space<any>>) attributes {dimension_semantics = [], scalar_prefetch = 0 : i64, scratch_operands = 0 : i64, tpu.core_type = #tpu.core_type<tc>} {
    return
  }
}

module attributes {stable_mosaic.version = 11 : i64} {
  func.func @_copy_kernel(%arg0: memref<2x4x16x16xf32, #tpu.memory_space<vmem>>, %arg1: memref<2x4x16x16xf32, #tpu.memory_space<vmem>>) attributes {dimension_semantics = [], scalar_prefetch = 0 : i64, scratch_operands = 0 : i64, tpu.core_type = #tpu.core_type<tc>} {
    %c0 = arith.constant 0 : index
    %c0_0 = arith.constant 0 : index
    %c0_1 = arith.constant 0 : index
    %c0_2 = arith.constant 0 : index
    %0 = vector.load %arg0[%c0, %c0_0, %c0_1, %c0_2] : memref<2x4x16x16xf32, #tpu.memory_space<vmem>>, vector<2x4x16x16xf32>
    %c0_3 = arith.constant 0 : index
    %c0_4 = arith.constant 0 : index
    %c0_5 = arith.constant 0 : index
    %c0_6 = arith.constant 0 : index
    %1 = vector.load %arg1[%c0_3, %c0_4, %c0_5, %c0_6] : memref<2x4x16x16xf32, #tpu.memory_space<vmem>>, vector<2x4x16x16xf32>
    tpu.vector_store %arg1[%c0_3, %c0_4, %c0_5, %c0_6], %0 {strides = array<i32>} : memref<2x4x16x16xf32, #tpu.memory_space<vmem>>, vector<2x4x16x16xf32>,
    return
  }
}

</mosaic_0001>

<bundles_post_ra>
// kernel: tpu_custom_call.1
= control target key start
LH: loop header
LB: loop body
LE: loop exit
PB: predicated region body
PF: predicated region fallthrough
CT: control target
= control target key end

     0   :  { %s16_s0 = inlined_call_operand.hbm [shape: f32[2,4,16,16], index: 0, kind: input, shape index: {}, may-alias: {0,1}]   ;;  %s17_s1 = inlined_call_operand.hbm [shape: f32[2,4,16,16], index: 1, kind: output, shape index: {}, may-alias: {0,1}]  }

// kernel: tpu_custom_call.1
= control target key start
LH: loop header
LB: loop body
LE: loop exit
PB: predicated region body
PF: predicated region fallthrough
CT: control target
= control target key end

     0   :  { %6 = vsyncpa [#allocation3], 0  ;;  %s163_s0 = inlined_call_operand.hbm [shape: f32[2,4,16,16], index: 0, kind: input, shape index: {}]   ;;  %s164_s1 = inlined_call_operand.hbm [shape: f32[2,4,16,16], index: 1, kind: output, shape index: {}]  }
   0x1   :  { %7 = vsyncpa [#allocation4], 0  ;;  %s121_s6 = smov [#allocation2]  }
   0x2   :  { %s13_s7 = sshll.u32 %s121_s6, 4  ;;  %s14_s7 = int_to_ptr.vmem [resolvable:$true] %s13_s7 }
   0x3   :  { %s85_s8 = scalar_lea.vmem %s14_s7, 2048  ;;  %p90_p1 = scmp.lt.s32.totalorder %s14_s7, %s14_s7 }
   0x4   :  { %p86_p0 = scmp.ne.s32.totalorder %s14_s7, %s85_s8  ;;  %p91_p2 = scmp.lt.s32.totalorder %s85_s8, %s85_s8 }
   0x6   :  { %p92_p3 = por %p91_p2, %p90_p1 }
   0x8   :  { %p93_p4 = pnand %p92_p3, %p86_p0 }
   0xa   :  { %96 = shalt.err (!%p93_p4)
}
   0xb   :  { %s122_s9 = smov 128   ;;  %s123_s10 = smov 8  }
   0xc   :  { %19 = dma.hbm_to_vmem [thread:$0]  %s163_s0, 2048, %s14_s7, [#allocation3], %s122_s9, %s122_s9, %s123_s10  }
   0xd   :  { %117 = dma.done.wait [#allocation3], 2048  }
   0xe   :  { %118 = vsyncadd [#allocation3], 4294965248  ;;  %vm39_vm0 = vcmask 130048   ;;  %v23_v0 = vld [vmem:[#allocation2] sm:$0xff]  ;;  %v24_v1 = vld [vmem:[#allocation2 + $0x8] sm:$0xff]  ;;  %s124_s13 = smov [#allocation5]  }
   0xf   :  { %v25_v2 = vld [vmem:[#allocation2 + $0x10] sm:$0xff]  ;;  %40 = vst.msk [vmem:[#allocation5] sm:$0xff] %vm39_vm0, %v23_v0  ;;  %41 = vst.msk [vmem:[#allocation5 + $0x8] sm:$0xff] %vm39_vm0, %v24_v1  ;;  %v26_v3 = vld [vmem:[#allocation2 + $0x18] sm:$0xff]  ;;  %s61_s14 = sshll.u32 %s124_s13, 4  ;;  %s62_s14 = int_to_ptr.vmem [resolvable:$true] %s61_s14 }
  0x10   :  { %42 = vst.msk [vmem:[#allocation5 + $0x10] sm:$0xff] %vm39_vm0, %v25_v2  ;;  %v27_v4 = vld [vmem:[#allocation2 + $0x20] sm:$0xff]  ;;  %v28_v5 = vld [vmem:[#allocation2 + $0x28] sm:$0xff]  ;;  %43 = vst.msk [vmem:[#allocation5 + $0x18] sm:$0xff] %vm39_vm0, %v26_v3  ;;  %s97_s0 = scalar_lea.vmem %s62_s14, 2048  ;;  %p102_p6 = scmp.lt.s32.totalorder %s62_s14, %s62_s14 }
  0x11   :  { %44 = vst.msk [vmem:[#allocation5 + $0x20] sm:$0xff] %vm39_vm0, %v27_v4  ;;  %45 = vst.msk [vmem:[#allocation5 + $0x28] sm:$0xff] %vm39_vm0, %v28_v5  ;;  %v29_v6 = vld [vmem:[#allocation2 + $0x30] sm:$0xff]  ;;  %v30_v7 = vld [vmem:[#allocation2 + $0x38] sm:$0xff]  ;;  %p98_p5 = scmp.ne.s32.totalorder %s62_s14, %s97_s0  ;;  %p103_p7 = scmp.lt.s32.totalorder %s97_s0, %s97_s0 }
  0x12   :  { %v31_v8 = vld [vmem:[#allocation2 + $0x40] sm:$0xff]  ;;  %46 = vst.msk [vmem:[#allocation5 + $0x30] sm:$0xff] %vm39_vm0, %v29_v6  ;;  %47 = vst.msk [vmem:[#allocation5 + $0x38] sm:$0xff] %vm39_vm0, %v30_v7  ;;  %v32_v9 = vld [vmem:[#allocation2 + $0x48] sm:$0xff] }
  0x13   :  { %48 = vst.msk [vmem:[#allocation5 + $0x40] sm:$0xff] %vm39_vm0, %v31_v8  ;;  %v33_v10 = vld [vmem:[#allocation2 + $0x50] sm:$0xff]  ;;  %v34_v11 = vld [vmem:[#allocation2 + $0x58] sm:$0xff]  ;;  %49 = vst.msk [vmem:[#allocation5 + $0x48] sm:$0xff] %vm39_vm0, %v32_v9  ;;  %p104_p8 = por %p103_p7, %p102_p6 }
  0x14   :  { %50 = vst.msk [vmem:[#allocation5 + $0x50] sm:$0xff] %vm39_vm0, %v33_v10  ;;  %51 = vst.msk [vmem:[#allocation5 + $0x58] sm:$0xff] %vm39_vm0, %v34_v11  ;;  %v35_v12 = vld [vmem:[#allocation2 + $0x60] sm:$0xff]  ;;  %v36_v13 = vld [vmem:[#allocation2 + $0x68] sm:$0xff] }
  0x15   :  { %v37_v14 = vld [vmem:[#allocation2 + $0x70] sm:$0xff]  ;;  %52 = vst.msk [vmem:[#allocation5 + $0x60] sm:$0xff] %vm39_vm0, %v35_v12  ;;  %53 = vst.msk [vmem:[#allocation5 + $0x68] sm:$0xff] %vm39_vm0, %v36_v13  ;;  %v38_v15 = vld [vmem:[#allocation2 + $0x78] sm:$0xff]  ;;  %p105_p9 = pnand %p104_p8, %p98_p5 }
  0x16   :  { %54 = vst.msk [vmem:[#allocation5 + $0x70] sm:$0xff] %vm39_vm0, %v37_v14  ;;  %55 = vst.msk [vmem:[#allocation5 + $0x78] sm:$0xff] %vm39_vm0, %v38_v15 }
  0x17   :  { %108 = shalt.err (!%p105_p9)
}
  0x18   :  { %67 = dma.vmem_to_hbm [thread:$0]  %s62_s14, 2048, %s164_s1, [#allocation4], %s122_s9, %s122_s9, %s123_s10  }
  0x19   :  { %119 = dma.done.wait [#allocation4], 2048  }
  0x1a   :  { %120 = vsyncadd [#allocation4], 4294965248 }
  0x1b   :  { %71 = vsyncpa [#allocation3], 1 }
  0x1c   :  { %72 = vsyncpa [#allocation4], 1 }

</bundles_post_ra>
